<compile_context>
chip_gen: v5e
topology: v5e:2x2
jax: 0.10.0
libtpu: 0.0.40
codegen_flags: <defaults>
</compile_context>

<pallas_src>
import jax
import jax.numpy as jnp
import numpy as np
from jax.experimental import pallas as pl
from jax.experimental.pallas import tpu as pltpu

NODE_SIZE = 4
EDGE_SIZE = 2
HIDDEN = 32
OUT_CH = 1
NNODES = 4
BATCH = 4

XAW = NODE_SIZE + 2 + 1  # x | action(2) | ones column (bias fold)


def critic_kernel(xa_ref, ea_ref, gcat_ref, scat_ref, poolt_ref,
                  wcat_ref, w2g_ref, pb_ref, vpu_ref, out_ref):
    """One grid step = one block of `graphs_per_block` graphs."""
    f32 = jnp.float32
    h = HIDDEN
    mxu = wcat_ref.dtype                 # bf16 (or f32) MXU-input dtype

    xa = xa_ref[0]                       # [Nb, 7]  x | action | 1   (f32)
    ea = ea_ref[0]                       # [Eb, 2]                   (f32)

    # Fused xa-side projection: ONE MXU pass with N = 3H lanes instead of three
    # N=H passes.  Columns: [w1(x_i rows)+b1 | w1(x_j rows) | lin1(x,a rows)+bl]
    # (biases folded through xa's ones column).
    px_all = jnp.dot(xa.astype(mxu), wcat_ref[...],
                     preferred_element_type=f32)                     # [Nb, 3H]
    px_i = px_all[:, 0:h]
    px_j = px_all[:, h:2 * h]
    pre_lin = px_all[:, 2 * h:3 * h]

    # Fused edge gather: [G_src | G_dst] @ [px_i ; px_j] is a single MXU pass
    # with K = 2*Nb (instead of two K=Nb passes + an add).  The K=2 edge_attr
    # contraction stays on the VPU as two broadcast-FMAs (kernel is latency
    # bound at these sizes; switch to a [Eb,2]x[2,H] dot if VPU ever binds).
    p_stack = jnp.concatenate([px_i, px_j], axis=0)                  # [2Nb, H]
    e_term = ea[:, 0:1] * vpu_ref[0:1, :] + ea[:, 1:2] * vpu_ref[1:2, :]
    h1 = jnp.dot(gcat_ref[...], p_stack.astype(mxu),
                 preferred_element_type=f32) + e_term
    h1 = jnp.maximum(h1, 0.0)                                        # [Eb, H]

    # Scatter-add BEFORE the second edge-MLP matmul; w2 is pre-folded with
    # lin1's agg block (w2g = w2 @ wl_g) and the skipped b2 bias is the
    # per-node degree-scaled term baked into pb_ref.
    aggh = jnp.dot(scat_ref[...], h1.astype(mxu),
                   preferred_element_type=f32)                       # [Nb, H]
    pre = (pre_lin
           + jnp.dot(aggh.astype(mxu), w2g_ref[...], preferred_element_type=f32)
           + pb_ref[...])
    h2 = jnp.maximum(pre, 0.0)                                       # [Nb, H]

    # g_to_v (N=1) and the per-graph sum: VPU lane-reduce + XLU sublane-reduce
    # instead of two degenerate MXU passes; output row is lane-dense [1, GB].
    v0 = jnp.sum(h2 * vpu_ref[2:3, :], axis=1, keepdims=True)        # [Nb, 1]
    per_graph = jnp.sum(poolt_ref[...] * v0, axis=0, keepdims=True)  # [1, GB]
    out_ref[0] = per_graph + vpu_ref[3:4, 0:1]


def _tpu_kind():
    try:
        return jax.devices()[0].device_kind.lower()
    except Exception:
        return ""


def make_critic(params, edge_index, batch, nnodes=NNODES, graphs_per_block=None,
                mxu_dtype=jnp.bfloat16):
    """Fold params + static topology once; returns critic(x, edge_attr, action) -> [B]."""
    edge_index = np.asarray(edge_index)
    h = HIDDEN
    n_total = batch * nnodes
    n_edges = edge_index.shape[1]

    if graphs_per_block is None:
        # Grid steps are a serial loop with ~0.35us fixed overhead each on one
        # TC: collapse the grid completely on single-TC chips (v5e/v6e).  v7x
        # has 2 TCs per chip, so keep two "parallel" steps to occupy both.
        kind = _tpu_kind()
        want_nb = 2 if ("v7" in kind and batch % 2 == 0) else 1
        graphs_per_block = batch // want_nb
    gb = graphs_per_block
    assert batch % gb == 0
    nb = batch // gb                      # grid steps (batch blocks)
    nblk = gb * nnodes                    # nodes per block
    assert n_edges % nb == 0
    eblk = n_edges // nb                  # edges per block

    # ---- static graph structure -> one-hot gather / scatter / pool blocks ----
    src, dst = edge_index[0], edge_index[1]
    blk = src // nblk
    assert np.array_equal(blk, dst // nblk), "edges must not cross batch blocks"
    assert np.array_equal(blk, np.repeat(np.arange(nb), eblk)), \
        "edges must be grouped by batch block"
    src_l = (src - blk * nblk).reshape(nb, eblk)
    dst_l = (dst - blk * nblk).reshape(nb, eblk)
    assert np.all(src_l == src_l[:1]) and np.all(dst_l == dst_l[:1]), \
        "per-block topology must be identical (one constant block reused every step)"

    eye = np.eye(nblk, dtype=np.float32)
    g_src = eye[src_l[0]]                 # [Eb, Nb] gathers x_i (flow='target_to_source')
    g_dst = eye[dst_l[0]]                 # [Eb, Nb] gathers x_j
    scat = g_src.T                        # [Nb, Eb] aggr='add' at edge_index[0]
    deg = scat.sum(axis=1)                # [Nb]     per-node aggregation count
    poolt = (np.arange(nblk)[:, None] // nnodes
             == np.arange(gb)[None, :]).astype(np.float32)          # [Nb, GB]

    # 0/1 one-hots are exact in bf16; casting halves the O(gb^2) VMEM footprint.
    gcat_c = jnp.asarray(np.concatenate([g_src, g_dst], axis=1)).astype(mxu_dtype)  # [Eb, 2Nb]
    scat_c = jnp.asarray(scat).astype(mxu_dtype)                                    # [Nb, Eb]
    poolt_c = jnp.asarray(poolt)                                                    # [Nb, GB] f32 (VPU)

    # ---- fold parameters once (no per-call XLA glue) ----
    w1, b1 = params['w1'], params['b1'].reshape(1, h)
    w2, b2 = params['w2'], params['b2'].reshape(1, h)
    wl, bl = params['wl'], params['bl'].reshape(1, h)
    wv, bv = params['wv'], params['bv'].reshape(1, OUT_CH)
    wl_x = wl[:NODE_SIZE]
    wl_g = wl[NODE_SIZE:NODE_SIZE + h]
    wl_a = wl[NODE_SIZE + h:]

    z1 = jnp.zeros((1, h), jnp.float32)
    z2 = jnp.zeros((2, h), jnp.float32)
    w_i = jnp.concatenate([w1[:NODE_SIZE], z2, b1], axis=0)                     # [7, H]
    w_j = jnp.concatenate([w1[NODE_SIZE:2 * NODE_SIZE], z2, z1], axis=0)        # [7, H]
    wl_xa = jnp.concatenate([wl_x, wl_a, bl], axis=0)                           # [7, H]
    wcat = jnp.concatenate([w_i, w_j, wl_xa], axis=1).astype(mxu_dtype)         # [7, 3H]

    w2g = jnp.dot(w2, wl_g).astype(mxu_dtype)                                   # [H, H]
    # degree-scaled b2 correction for the scatter-before-w2 reorder (f32, added post-dot)
    prebias = jnp.asarray(deg)[:, None] * jnp.dot(b2, wl_g)                     # [Nb, H]
    # VPU-side operands stay f32 (v5e has no bf16 VPU): edge_attr weight rows,
    # g_to_v weight row, pooled-bias row.
    vpu_pack = jnp.concatenate(
        [w1[2 * NODE_SIZE:],                                   # rows 0..1: w1[edge rows]
         wv.T,                                                 # row 2: wv^T
         jnp.full((1, h), nnodes * bv[0, 0], jnp.float32)],    # row 3: nnodes*bv
        axis=0)                                                # [4, H]

    # ---- advisory cost estimate (lets XLA schedule around the call) ----
    it = jnp.dtype(mxu_dtype).itemsize
    flops = 2 * nb * (nblk * XAW * 3 * h          # fused xa projection
                      + eblk * (2 * nblk) * h     # fused gather
                      + nblk * eblk * h           # scatter-add
                      + nblk * h * h)             # w2g
    bytes_accessed = (nb * nblk * XAW * 4 + nb * eblk * EDGE_SIZE * 4
                      + eblk * 2 * nblk * it + nblk * eblk * it
                      + nblk * gb * 4 + XAW * 3 * h * it + h * h * it
                      + nblk * h * 4 + 4 * h * 4 + nb * gb * 4)
    cost = pl.CostEstimate(flops=flops, transcendentals=0,
                           bytes_accessed=bytes_accessed)

    blk3 = lambda i: (i, 0, 0)
    cst2 = lambda i: (0, 0)

    call = pl.pallas_call(
        critic_kernel,
        out_shape=jax.ShapeDtypeStruct((nb, 1, gb), jnp.float32),
        grid=(nb,),
        in_specs=[
            pl.BlockSpec((1, nblk, XAW), blk3),          # x|action|1       (runtime, f32)
            pl.BlockSpec((1, eblk, EDGE_SIZE), blk3),    # edge_attr        (runtime, f32)
            pl.BlockSpec((eblk, 2 * nblk), cst2),        # [Gsrc | Gdst]    (const)
            pl.BlockSpec((nblk, eblk), cst2),            # scatter          (const)
            pl.BlockSpec((nblk, gb), cst2),              # pool^T           (const, f32)
            pl.BlockSpec((XAW, 3 * h), cst2),            # [w_i|w_j|wl_xa]  (const)
            pl.BlockSpec((h, h), cst2),                  # w2 @ wl_g        (const)
            pl.BlockSpec((nblk, h), cst2),               # deg-scaled b2    (const, f32)
            pl.BlockSpec((4, h), cst2),                  # VPU pack         (const, f32)
        ],
        out_specs=pl.BlockSpec((1, 1, gb), blk3),
        compiler_params=pltpu.CompilerParams(
            dimension_semantics=("parallel",)),          # 2 TCs on v7x; no-op on v5e/v6e
        cost_estimate=cost,
    )

    @jax.jit
    def critic(x, edge_attr, action):
        # Per-call glue is only reshapes + one small concat: no gathers, no
        # one-hot construction, no HBM round-trip of [E, 2*ns+es] intermediates.
        act_flat = action.reshape(n_total, 2)
        ones = jnp.ones((n_total, 1), jnp.float32)
        xa = jnp.concatenate([x, act_flat, ones], axis=1).reshape(nb, nblk, XAW)
        ea = edge_attr.reshape(nb, eblk, EDGE_SIZE)
        out = call(xa, ea, gcat_c, scat_c, poolt_c, wcat, w2g, prebias, vpu_pack)
        return out.reshape(batch)

    return critic


def critic_reference(params, edge_index, x, edge_attr, action):
    """Pure-JAX mirror of the PyTorch forward (sanity check)."""
    src, dst = edge_index[0], edge_index[1]
    tmp = jnp.concatenate([x[src], x[dst], edge_attr], axis=1)
    hh = jnp.maximum(tmp @ params['w1'] + params['b1'], 0.0)
    msg = hh @ params['w2'] + params['b2']
    agg = jax.ops.segment_sum(msg, src, num_segments=x.shape[0])
    x_pp = jnp.concatenate([x, agg], axis=1).reshape(-1, NNODES, NODE_SIZE + HIDDEN)
    concat = jnp.concatenate([x_pp, action], axis=-1)
    h2 = jnp.maximum(concat @ params['wl'] + params['bl'], 0.0)
    v = h2 @ params['wv'] + params['bv']
    return jnp.sum(v, axis=1).squeeze(-1)


def init_params(key):
    def linear(key, fan_in, fan_out):
        kw, kb = jax.random.split(key)
        bound = 1.0 / np.sqrt(fan_in)
        w = jax.random.uniform(kw, (fan_in, fan_out), jnp.float32, -bound, bound)
        b = jax.random.uniform(kb, (1, fan_out), jnp.float32, -bound, bound)
        return w, b

    k1, k2, k3, k4 = jax.random.split(key, 4)
    w1, b1 = linear(k1, 2 * NODE_SIZE + EDGE_SIZE, HIDDEN)      # EdgeConv mlp[0]
    w2, b2 = linear(k2, HIDDEN, HIDDEN)                         # EdgeConv mlp[2]
    wl, bl = linear(k3, NODE_SIZE + HIDDEN + 2, HIDDEN)         # lin1
    wv, bv = linear(k4, HIDDEN, OUT_CH)                         # g_to_v
    return dict(w1=w1, b1=b1, w2=w2, b2=b2, wl=wl, bl=bl, wv=wv, bv=bv)


if __name__ == "__main__":
    key = jax.random.PRNGKey(0)
    kp, kx, ke, ka = jax.random.split(key, 4)

    params = init_params(kp)

    n_total = BATCH * NNODES
    x = jax.random.normal(kx, (n_total, NODE_SIZE), jnp.float32)
    action = jax.random.normal(ka, (BATCH, NNODES, 2), jnp.float32)

    # Fully-connected directed edges (no self-loops) within each graph; static topology.
    src_list, dst_list = [], []
    for b in range(BATCH):
        for i in range(NNODES):
            for j in range(NNODES):
                if i != j:
                    src_list.append(b * NNODES + i)
                    dst_list.append(b * NNODES + j)
    edge_index = np.asarray([src_list, dst_list], dtype=np.int32)    # [2, E]
    n_edges = edge_index.shape[1]
    edge_attr = jax.random.normal(ke, (n_edges, EDGE_SIZE), jnp.float32)

    # Auto block selection: whole batch per step on v5e/v6e (grid=(1,)),
    # two parallel steps on v7x; bf16 MXU inputs, f32 accumulation.
    critic = make_critic(params, edge_index, BATCH, NNODES)

    v = critic(x, edge_attr, action)
    v = jax.block_until_ready(v)

    v_ref = critic_reference(params, jnp.asarray(edge_index), x, edge_attr, action)
    # bf16 MXU inputs (f32 accumulation) -> loosen tolerance vs. the pure-f32 reference.
    np.testing.assert_allclose(np.asarray(v), np.asarray(v_ref), rtol=2e-2, atol=2e-2)

    print("KERNEL_OK")
</pallas_src>

<mosaic_0001>
module attributes {stable_mosaic.version = 11 : i64} {
  func.func @critic_kernel(%arg0: i32, %arg1: memref<1x16x7xf32, #tpu.memory_space<vmem>>, %arg2: memref<1x48x2xf32, #tpu.memory_space<vmem>>, %arg3: memref<48x32xbf16, #tpu.memory_space<vmem>>, %arg4: memref<16x48xbf16, #tpu.memory_space<vmem>>, %arg5: memref<16x4xf32, #tpu.memory_space<vmem>>, %arg6: memref<7x96xbf16, #tpu.memory_space<vmem>>, %arg7: memref<32x32xbf16, #tpu.memory_space<vmem>>, %arg8: memref<16x32xf32, #tpu.memory_space<vmem>>, %arg9: memref<4x32xf32, #tpu.memory_space<vmem>>, %arg10: memref<1x1x4xf32, #tpu.memory_space<vmem>>) attributes {dimension_semantics = [#tpu.dimension_semantics<parallel>], iteration_bounds = array<i64: 1>, scalar_prefetch = 0 : i64, scratch_operands = 0 : i64, tpu.core_type = #tpu.core_type<tc>, window_params = [{transform_indices = @transform_0, window_bounds = array<i64: 1, 16, 7>}, {transform_indices = @transform_1, window_bounds = array<i64: 1, 48, 2>}, {pipeline_mode = #tpu.pipeline_mode<synchronous>, transform_indices = @transform_2, window_bounds = array<i64: 48, 32>}, {pipeline_mode = #tpu.pipeline_mode<synchronous>, transform_indices = @transform_3, window_bounds = array<i64: 16, 48>}, {pipeline_mode = #tpu.pipeline_mode<synchronous>, transform_indices = @transform_4, window_bounds = array<i64: 16, 4>}, {pipeline_mode = #tpu.pipeline_mode<synchronous>, transform_indices = @transform_5, window_bounds = array<i64: 7, 96>}, {pipeline_mode = #tpu.pipeline_mode<synchronous>, transform_indices = @transform_6, window_bounds = array<i64: 32, 32>}, {pipeline_mode = #tpu.pipeline_mode<synchronous>, transform_indices = @transform_7, window_bounds = array<i64: 16, 32>}, {pipeline_mode = #tpu.pipeline_mode<synchronous>, transform_indices = @transform_8, window_bounds = array<i64: 4, 32>}, {transform_indices = @transform_9, window_bounds = array<i64: 1, 1, 4>}]} {
    %c0 = arith.constant 0 : index
    %c0_0 = arith.constant 0 : index
    %c0_1 = arith.constant 0 : index
    %0 = vector.load %arg1[%c0, %c0_0, %c0_1] : memref<1x16x7xf32, #tpu.memory_space<vmem>>, vector<1x16x7xf32>
    %1 = vector.shape_cast %0 : vector<1x16x7xf32> to vector<16x7xf32>
    %c0_2 = arith.constant 0 : index
    %c0_3 = arith.constant 0 : index
    %c0_4 = arith.constant 0 : index
    %2 = vector.load %arg2[%c0_2, %c0_3, %c0_4] : memref<1x48x2xf32, #tpu.memory_space<vmem>>, vector<1x48x2xf32>
    %3 = vector.shape_cast %2 : vector<1x48x2xf32> to vector<48x2xf32>
    %4 = arith.truncf %1 : vector<16x7xf32> to vector<16x7xbf16>
    %c0_5 = arith.constant 0 : index
    %c0_6 = arith.constant 0 : index
    %5 = vector.load %arg6[%c0_5, %c0_6] : memref<7x96xbf16, #tpu.memory_space<vmem>>, vector<7x96xbf16>
    %cst = arith.constant dense<0.000000e+00> : vector<16x96xf32>
    %6 = tpu.matmul %4, %5, %cst {dimension_numbers = #tpu.dot_dimension_numbers<[1], [0], [0], [1], [0, 0, 1, 1], [], []>} : vector<16x7xbf16>, vector<7x96xbf16>, vector<16x96xf32> -> vector<16x96xf32>
    %7 = vector.extract_strided_slice %6 {offsets = [0, 0], sizes = [16, 32], strides = [1, 1]} : vector<16x96xf32> to vector<16x32xf32>
    %8 = vector.extract_strided_slice %6 {offsets = [0, 32], sizes = [16, 32], strides = [1, 1]} : vector<16x96xf32> to vector<16x32xf32>
    %9 = vector.extract_strided_slice %6 {offsets = [0, 64], sizes = [16, 32], strides = [1, 1]} : vector<16x96xf32> to vector<16x32xf32>
    %10 = tpu.concatenate %7, %8 in 0 : vector<16x32xf32>, vector<16x32xf32> -> vector<32x32xf32>
    %11 = vector.extract_strided_slice %3 {offsets = [0, 0], sizes = [48, 1], strides = [1, 1]} : vector<48x2xf32> to vector<48x1xf32>
    %c0_7 = arith.constant 0 : index
    %c0_8 = arith.constant 0 : index
    %12 = vector.load %arg9[%c0_7, %c0_8] : memref<4x32xf32, #tpu.memory_space<vmem>>, vector<1x32xf32>
    %13 = vector.broadcast %11 : vector<48x1xf32> to vector<48x32xf32>
    %14 = vector.broadcast %12 : vector<1x32xf32> to vector<48x32xf32>
    %15 = arith.mulf %13, %14 : vector<48x32xf32>
    %16 = vector.extract_strided_slice %3 {offsets = [0, 1], sizes = [48, 1], strides = [1, 1]} : vector<48x2xf32> to vector<48x1xf32>
    %c1 = arith.constant 1 : index
    %c0_9 = arith.constant 0 : index
    %17 = vector.load %arg9[%c1, %c0_9] : memref<4x32xf32, #tpu.memory_space<vmem>>, vector<1x32xf32>
    %18 = vector.broadcast %16 : vector<48x1xf32> to vector<48x32xf32>
    %19 = vector.broadcast %17 : vector<1x32xf32> to vector<48x32xf32>
    %20 = arith.mulf %18, %19 : vector<48x32xf32>
    %21 = arith.addf %15, %20 : vector<48x32xf32>
    %c0_10 = arith.constant 0 : index
    %c0_11 = arith.constant 0 : index
    %22 = vector.load %arg3[%c0_10, %c0_11] : memref<48x32xbf16, #tpu.memory_space<vmem>>, vector<48x32xbf16>
    %23 = arith.truncf %10 : vector<32x32xf32> to vector<32x32xbf16>
    %cst_12 = arith.constant dense<0.000000e+00> : vector<48x32xf32>
    %24 = tpu.matmul %22, %23, %cst_12 {dimension_numbers = #tpu.dot_dimension_numbers<[1], [0], [0], [1], [0, 0, 1, 1], [], []>} : vector<48x32xbf16>, vector<32x32xbf16>, vector<48x32xf32> -> vector<48x32xf32>
    %25 = arith.addf %24, %21 : vector<48x32xf32>
    %cst_13 = arith.constant 0.000000e+00 : f32
    %26 = vector.broadcast %cst_13 : f32 to vector<48x32xf32>
    %27 = arith.maximumf %25, %26 : vector<48x32xf32>
    %c0_14 = arith.constant 0 : index
    %c0_15 = arith.constant 0 : index
    %28 = vector.load %arg4[%c0_14, %c0_15] : memref<16x48xbf16, #tpu.memory_space<vmem>>, vector<16x48xbf16>
    %29 = arith.truncf %27 : vector<48x32xf32> to vector<48x32xbf16>
    %cst_16 = arith.constant dense<0.000000e+00> : vector<16x32xf32>
    %30 = tpu.matmul %28, %29, %cst_16 {dimension_numbers = #tpu.dot_dimension_numbers<[1], [0], [0], [1], [0, 0, 1, 1], [], []>} : vector<16x48xbf16>, vector<48x32xbf16>, vector<16x32xf32> -> vector<16x32xf32>
    %31 = arith.truncf %30 : vector<16x32xf32> to vector<16x32xbf16>
    %c0_17 = arith.constant 0 : index
    %c0_18 = arith.constant 0 : index
    %32 = vector.load %arg7[%c0_17, %c0_18] : memref<32x32xbf16, #tpu.memory_space<vmem>>, vector<32x32xbf16>
    %cst_19 = arith.constant dense<0.000000e+00> : vector<16x32xf32>
    %33 = tpu.matmul %31, %32, %cst_19 {dimension_numbers = #tpu.dot_dimension_numbers<[1], [0], [0], [1], [0, 0, 1, 1], [], []>} : vector<16x32xbf16>, vector<32x32xbf16>, vector<16x32xf32> -> vector<16x32xf32>
    %34 = arith.addf %9, %33 : vector<16x32xf32>
    %c0_20 = arith.constant 0 : index
    %c0_21 = arith.constant 0 : index
    %35 = vector.load %arg8[%c0_20, %c0_21] : memref<16x32xf32, #tpu.memory_space<vmem>>, vector<16x32xf32>
    %36 = arith.addf %34, %35 : vector<16x32xf32>
    %cst_22 = arith.constant 0.000000e+00 : f32
    %37 = vector.broadcast %cst_22 : f32 to vector<16x32xf32>
    %38 = arith.maximumf %36, %37 : vector<16x32xf32>
    %c2 = arith.constant 2 : index
    %c0_23 = arith.constant 0 : index
    %39 = vector.load %arg9[%c2, %c0_23] : memref<4x32xf32, #tpu.memory_space<vmem>>, vector<1x32xf32>
    %40 = vector.broadcast %39 : vector<1x32xf32> to vector<16x32xf32>
    %41 = arith.mulf %38, %40 : vector<16x32xf32>
    %cst_24 = arith.constant dense<0.000000e+00> : vector<16xf32>
    %42 = vector.multi_reduction <add>, %41, %cst_24 [1] : vector<16x32xf32> to vector<16xf32>
    %43 = vector.shape_cast %42 : vector<16xf32> to vector<16x1xf32>
    %c0_25 = arith.constant 0 : index
    %c0_26 = arith.constant 0 : index
    %44 = vector.load %arg5[%c0_25, %c0_26] : memref<16x4xf32, #tpu.memory_space<vmem>>, vector<16x4xf32>
    %45 = vector.broadcast %43 : vector<16x1xf32> to vector<16x4xf32>
    %46 = arith.mulf %44, %45 : vector<16x4xf32>
    %cst_27 = arith.constant dense<0.000000e+00> : vector<4xf32>
    %47 = vector.multi_reduction <add>, %46, %cst_27 [0] : vector<16x4xf32> to vector<4xf32>
    %48 = vector.shape_cast %47 : vector<4xf32> to vector<1x4xf32>
    %c3 = arith.constant 3 : index
    %c0_28 = arith.constant 0 : index
    %49 = vector.load %arg9[%c3, %c0_28] : memref<4x32xf32, #tpu.memory_space<vmem>>, vector<1x1xf32>
    %50 = vector.broadcast %49 : vector<1x1xf32> to vector<1x4xf32>
    %51 = arith.addf %48, %50 : vector<1x4xf32>
    %c0_29 = arith.constant 0 : index
    %c0_30 = arith.constant 0 : index
    %c0_31 = arith.constant 0 : index
    %52 = vector.load %arg10[%c0_29, %c0_30, %c0_31] : memref<1x1x4xf32, #tpu.memory_space<vmem>>, vector<1x1x4xf32>
    %53 = vector.shape_cast %52 : vector<1x1x4xf32> to vector<1x4xf32>
    %54 = vector.shape_cast %51 : vector<1x4xf32> to vector<1x1x4xf32>
    tpu.vector_store %arg10[%c0_29, %c0_30, %c0_31], %54 {strides = array<i32>} : memref<1x1x4xf32, #tpu.memory_space<vmem>>, vector<1x1x4xf32>,
    return
  }
  func.func @transform_0(%arg0: i32) -> (i32, i32, i32) {
    %c0_i32 = arith.constant 0 : i32
    %c0_i32_0 = arith.constant 0 : i32
    %c0_i32_1 = arith.constant 0 : i32
    return %arg0, %c0_i32, %c0_i32_0 : i32, i32, i32
  }
  func.func @transform_1(%arg0: i32) -> (i32, i32, i32) {
    %c0_i32 = arith.constant 0 : i32
    %c0_i32_0 = arith.constant 0 : i32
    %c0_i32_1 = arith.constant 0 : i32
    return %arg0, %c0_i32, %c0_i32_0 : i32, i32, i32
  }
  func.func @transform_2(%arg0: i32) -> (i32, i32) {
    %c0_i32 = arith.constant 0 : i32
    %c0_i32_0 = arith.constant 0 : i32
    %c0_i32_1 = arith.constant 0 : i32
    return %c0_i32, %c0_i32_0 : i32, i32
  }
  func.func @transform_3(%arg0: i32) -> (i32, i32) {
    %c0_i32 = arith.constant 0 : i32
    %c0_i32_0 = arith.constant 0 : i32
    %c0_i32_1 = arith.constant 0 : i32
    return %c0_i32, %c0_i32_0 : i32, i32
  }
  func.func @transform_4(%arg0: i32) -> (i32, i32) {
    %c0_i32 = arith.constant 0 : i32
    %c0_i32_0 = arith.constant 0 : i32
    %c0_i32_1 = arith.constant 0 : i32
    return %c0_i32, %c0_i32_0 : i32, i32
  }
  func.func @transform_5(%arg0: i32) -> (i32, i32) {
    %c0_i32 = arith.constant 0 : i32
    %c0_i32_0 = arith.constant 0 : i32
    %c0_i32_1 = arith.constant 0 : i32
    return %c0_i32, %c0_i32_0 : i32, i32
  }
  func.func @transform_6(%arg0: i32) -> (i32, i32) {
    %c0_i32 = arith.constant 0 : i32
    %c0_i32_0 = arith.constant 0 : i32
    %c0_i32_1 = arith.constant 0 : i32
    return %c0_i32, %c0_i32_0 : i32, i32
  }
  func.func @transform_7(%arg0: i32) -> (i32, i32) {
    %c0_i32 = arith.constant 0 : i32
    %c0_i32_0 = arith.constant 0 : i32
    %c0_i32_1 = arith.constant 0 : i32
    return %c0_i32, %c0_i32_0 : i32, i32
  }
  func.func @transform_8(%arg0: i32) -> (i32, i32) {
    %c0_i32 = arith.constant 0 : i32
    %c0_i32_0 = arith.constant 0 : i32
    %c0_i32_1 = arith.constant 0 : i32
    return %c0_i32, %c0_i32_0 : i32, i32
  }
  func.func @transform_9(%arg0: i32) -> (i32, i32, i32) {
    %c0_i32 = arith.constant 0 : i32
    %c0_i32_0 = arith.constant 0 : i32
    %c0_i32_1 = arith.constant 0 : i32
    return %arg0, %c0_i32, %c0_i32_0 : i32, i32, i32
  }
}

</mosaic_0001>

<bundles_post_ra>
// kernel: critic.1
= control target key start
LH: loop header
LB: loop body
LE: loop exit
PB: predicated region body
PF: predicated region fallthrough
CT: control target
= control target key end

     0   :  { %vm48_vm0 = vcmask 1042432   ;;  %vm49_vm1 = vcmask 1043456   ;;  %v453_v1 = vmov 65535   ;;  %s597_s0 = inlined_call_operand.vmem [shape: f32[1,16,7], index: 0, kind: input, shape index: {}]   ;;  %s598_s1 = inlined_call_operand.vmem [shape: f32[1,48,2], index: 1, kind: input, shape index: {}]   ;;  %s599_s2 = inlined_call_operand.vmem [shape: bf16[48,32], index: 2, kind: input, shape index: {}]   ;;  %s600_s3 = inlined_call_operand.vmem [shape: bf16[16,48], index: 3, kind: input, shape index: {}]   ;;  %s601_s4 = inlined_call_operand.vmem [shape: f32[16,4], index: 4, kind: input, shape index: {}]   ;;  %s602_s5 = inlined_call_operand.vmem [shape: bf16[7,96], index: 5, kind: input, shape index: {}]   ;;  %s603_s6 = inlined_call_operand.vmem [shape: bf16[32,32], index: 6, kind: input, shape index: {}]   ;;  %s604_s7 = inlined_call_operand.vmem [shape: f32[16,32], index: 7, kind: input, shape index: {}]   ;;  %s605_s8 = inlined_call_operand.vmem [shape: f32[4,32], index: 8, kind: input, shape index: {}]   ;;  %s606_s9 = inlined_call_operand.hbm [shape: f32[1,1,4], index: 9, kind: output, shape index: {}]  }
   0x1   :  { %v43_v0 = vld [vmem:[%s602_s5] sm:$0xf]  ;;  %v50_v2 = vsel %vm48_vm0, 4294967295, %v453_v1  ;;  %v35_v4 = vld [vmem:[%s597_s0 + $0x8] sm:$0xff] }
   0x2   :  { %v34_v3 = vld [vmem:[%s597_s0] sm:$0xff]  ;;  %v51_v5 = vsel %vm49_vm1, %v50_v2, 0 }
   0x3   :  { %v53_v6 = vand.u32 %v51_v5, %v43_v0 }
   0x4   :  { %14 = vsyncpa [#allocation3], 0  ;;  %v42_v7 = vpack.c.bf16 %v35_v4, %v34_v3  ;;  %vm44_vm2 = vcmask 56320   ;;  %v41_v8 = vld [vmem:[%s598_s1 + $0x28] sm:$0xff]  ;;  %v454_v9 = vmov 0   ;;  %s455_s0 = smov 96  }
   0x5   :  { %62 = vmatpush.bf16.msra.mxu0 %v53_v6  ;;  %413 = vset.pattern.permute.xlu1 %v454_v9  ;;  %v40_v13 = vld [vmem:[%s598_s1 + $0x20] sm:$0xff]  ;;  %v456_v14 = vmov 1   ;;  %v39_v15 = vld [vmem:[%s598_s1 + $0x18] sm:$0xff]  ;;  %v38_v17 = vld [vmem:[%s598_s1 + $0x10] sm:$0xff]  ;;  %vm176_vm3 = vcmask 261120   ;;  %vm226_vm4 = vcmask 392192  }
   0x6   :  { %412 = vset.pattern.permute.xlu0 %v454_v9  ;;  %105 = vperm.xlu1 %413, %v41_v8   ;;  %v36_v16 = vld [vmem:[%s598_s1] sm:$0xff]  ;;  %v394_v23 = vld [vmem:[%s599_s2 + $0x8] sm:$0xff]  ;;  %v395_v26 = vld [vmem:[%s599_s2 + $0x10] sm:$0xff]  ;;  %s457_s18 = smov 64   ;;  %vm328_vm5 = vcmask 31744   ;;  %s354_s30 = sshll.u32 %s606_s9, 4  ;;  %s355_s30 = int_to_ptr.hbm [resolvable:$true] %s354_s30 }
   0x7   :  { %415 = vset.pattern.permute.xlu2 %v456_v14  ;;  %v393_v24 = vld [vmem:[%s599_s2] sm:$0xff]  ;;  %v37_v25 = vld [vmem:[%s598_s1 + $0x8] sm:$0xff]  ;;  %vm345_vm6 = vcmask 24576  }
   0x8   :  { %363 = vmatmul.msk.bf16.vlgmr.msra.gmra.mxu0 %vm44_vm2, %v42_v7  ;;  %137 = vperm.xlu2 %415, %v41_v8   ;;  %v424_v39 = vld [vmem:[%s605_s8 + $0x1] ss:$0 sm:$0xff]  ;;  %v425_v40 = vld [vmem:[%s605_s8] ss:$0 sm:$0xff] }
   0xe   :  { %414 = vset.pattern.permute.xlu1 %v456_v14 }
   0xf   :  { %133 = vperm.xlu1 %414, %v40_v13  }
  0x10   :  { %416 = vset.pattern.permute.xlu2 %v454_v9 }
  0x11   :  { %90 = vperm.xlu2 %416, %v38_v17  }
  0x17   :  { %417 = vset.pattern.permute.xlu1 %v454_v9 }
  0x18   :  { %95 = vperm.xlu1 %417, %v39_v15  }
  0x19   :  { %418 = vset.pattern.permute.xlu2 %v456_v14 }
  0x1a   :  { %125 = vperm.xlu2 %418, %v38_v17  }
  0x20   :  { %80 = vperm.xlu1 %417, %v36_v16  }
  0x22   :  { %420 = vset.pattern.permute.xlu2 %v454_v9 }
  0x23   :  { %85 = vperm.xlu2 %420, %v37_v25  }
  0x28   :  { %421 = vset.pattern.permute.xlu1 %v456_v14 }
  0x29   :  { %117 = vperm.xlu1 %421, %v36_v16  }
  0x2b   :  { %422 = vset.pattern.permute.xlu2 %v456_v14 }
  0x2c   :  { %121 = vperm.xlu2 %422, %v37_v25  }
  0x62   :  { %v138_v27 = vpop.permute.xlu2 %137 }
  0x63   :  { %v146_v49 = vmul.f32 %v424_v39, %v138_v27 }
  0x6b   :  { %v91_v29 = vpop.permute.xlu2 %90 }
  0x6c   :  { %v111_v51 = vmul.f32 %v425_v40, %v91_v29 }
  0x74   :  { %v126_v31 = vpop.permute.xlu2 %125 }
  0x75   :  { %v143_v52 = vmul.f32 %v424_v39, %v126_v31 }
  0x77   :  { %v149_v59 = vadd.f32 %v143_v52, %v111_v51 }
  0x78   :  { %v106_v28 = vpop.permute.xlu1 %105 }
  0x79   :  { %v114_v50 = vmul.f32 %v425_v40, %v106_v28  ;;  %v426_v28 = vld [vmem:[%s605_s8 + $0x2] ss:$0 sm:$0xff] }
  0x7b   :  { %v152_v61 = vadd.f32 %v146_v49, %v114_v50 }
  0x7d   :  { %v86_v35 = vpop.permute.xlu2 %85 }
  0x7e   :  { %v110_v53 = vmul.f32 %v425_v40, %v86_v35 }
  0x81   :  { %v134_v30 = vpop.permute.xlu1 %133 }
  0x82   :  { %v145_v43 = vmul.f32 %v424_v39, %v134_v30 }
  0x85   :  { %v521_v10 = vpop.f32.mrf.mxu0 }
  0x86   :  { %v122_v47 = vpop.permute.xlu2 %121 }
  0x87   :  { %v142_v56 = vmul.f32 %v424_v39, %v122_v47  ;;  %v325_v47 = vld [vmem:[%s601_s4 + $0x8] sm:$0xff] }
  0x89   :  { %v148_v1 = vadd.f32 %v142_v56, %v110_v53 }
  0x8a   :  { %v96_v32 = vpop.permute.xlu1 %95 }
  0x8b   :  { %v112_v44 = vmul.f32 %v425_v40, %v96_v32 }
  0x8d   :  { %v523_v11 = vpop.f32.mrf.mxu0 }
  0x8e   :  { %v407_v12 = vpack.i.bf16 %v523_v11, %v521_v10  ;;  %v159_v22 = vpack.c.bf16 %v523_v11, %v521_v10 }
  0x90   :  { %408 = vrot.lane.b32.xlu0 %v407_v12, %s455_s0 }
  0x92   :  { %v81_v36 = vpop.permute.xlu1 %80 }
  0x93   :  { %v109_v54 = vmul.f32 %v425_v40, %v81_v36 }
  0x98   :  { %100 = vperm.xlu0 %412, %v40_v13  }
  0x9b   :  { %v118_v48 = vpop.permute.xlu1 %117 }
  0x9c   :  { %v141_v57 = vmul.f32 %v424_v39, %v118_v48 }
  0x9e   :  { %v147_v0 = vadd.f32 %v141_v57, %v109_v54 }
  0xa0   :  { %419 = vset.pattern.permute.xlu0 %v456_v14 }
  0xa1   :  { %129 = vperm.xlu0 %419, %v39_v15  }
  0xa9   :  { %423 = vset.pattern.permute.xlu0 %v454_v9 }
 0x102   :  { %v409_v18 = vpop.permute.xlu0 %408 }
 0x103   :  { %v411_v19 = vunpack.i.h.bf16 %v409_v18  ;;  %v410_v20 = vunpack.i.l.bf16 %v409_v18  ;;  %v396_v18 = vld [vmem:[%s600_s3] sm:$0xff] }
 0x105   :  { %v160_v21 = vpack.c.bf16 %v411_v19, %v410_v20  ;;  %v398_v19 = vld [vmem:[%s603_s6 + $0x8] sm:$0xff]  ;;  %v397_v20 = vld [vmem:[%s603_s6] sm:$0xff] }
 0x106   :  { %270 = vmatpush.bf16.msra.mxu3 %v398_v19 }
 0x107   :  { %192 = vmatpush.bf16.msrb.mxu0 %v160_v21  ;;  %399 = vmatpush.bf16.msra.mxu1 %v160_v21 }
 0x10a   :  { %v101_v34 = vpop.permute.xlu0 %100  ;;  %271 = vmatpush.bf16.msra.mxu3 %v397_v20 }
 0x10b   :  { %193 = vmatpush.bf16.msrb.mxu0 %v159_v22  ;;  %400 = vmatpush.bf16.msra.mxu1 %v159_v22  ;;  %v113_v45 = vmul.f32 %v425_v40, %v101_v34 }
 0x10d   :  { %v151_v58 = vadd.f32 %v145_v43, %v113_v45  ;;  %v324_v45 = vld [vmem:[%s601_s4] sm:$0xff] }
 0x10e   :  { %377 = vmatmul.msk.bf16.vlgmr.msra.gmra.mxu1 %vm176_vm3, %v394_v23  ;;  %376 = vmatmul.msk.bf16.vlgmr.msrb.gmra.mxu0 %vm176_vm3, %v393_v24  ;;  %v288_v24 = vld [vmem:[%s604_s7] sm:$0xff] }
 0x10f   :  { %292 = vrot.lane.b32.xlu2 %v288_v24, %s457_s18 }
 0x113   :  { %v130_v38 = vpop.permute.xlu0 %129 }
 0x114   :  { %v144_v46 = vmul.f32 %v424_v39, %v130_v38 }
 0x116   :  { %v150_v55 = vadd.f32 %v144_v46, %v112_v44 }
 0x11e   :  { %378 = vmatmul.msk.bf16.gmra.mxu1 %vm176_vm3, %v395_v26  ;;  %v289_v26 = vld [vmem:[%s604_s7 + $0x8] sm:$0xff] }
 0x169   :  { %v293_v31 = vpop.permute.xlu2 %292 }
 0x18b   :  { %v200_v33 = vpop.f32.mrf.mxu1  ;;  %v195_v41 = vpop.f32.mrf.mxu0 }
 0x18c   :  { %v201_v4 = vadd.f32 %v200_v33, %v149_v59  ;;  %v196_v12 = vadd.f32 %v195_v41, %v147_v0 }
 0x18e   :  { %v212_v13 = vmax.f32 %v201_v4, 0.0  ;;  %v210_v16 = vmax.f32 %v196_v12, 0.0 }
 0x193   :  { %v202_v37 = vpop.f32.mrf.mxu1  ;;  %v197_v3 = vpop.f32.mrf.mxu0 }
 0x194   :  { %v203_v63 = vadd.f32 %v202_v37, %v150_v55  ;;  %v198_v8 = vadd.f32 %v197_v3, %v148_v1 }
 0x196   :  { %v213_v7 = vmax.f32 %v203_v63, 0.0  ;;  %v211_v14 = vmax.f32 %v198_v8, 0.0 }
 0x198   :  { %v219_v15 = vpack.c.bf16 %v213_v7, %v212_v13  ;;  %v218_v17 = vpack.c.bf16 %v211_v14, %v210_v16 }
 0x19b   :  { %v205_v42 = vpop.f32.mrf.mxu1 }
 0x19c   :  { %v206_v60 = vadd.f32 %v205_v42, %v151_v58  ;;  %v338_v42 = vld [vmem:[%s605_s8 + $0x3] sm:$0x1]  ;;  %s458_s8 = smov [#allocation2]  }
 0x19d   :  { %s352_s27 = sshll.u32 %s458_s8, 4  ;;  %s353_s27 = int_to_ptr.vmem [resolvable:$true] %s352_s27 }
 0x19e   :  { %v214_v5 = vmax.f32 %v206_v60, 0.0 }
 0x1a3   :  { %v207_v62 = vpop.f32.mrf.mxu1 }
 0x1a4   :  { %v208_v2 = vadd.f32 %v207_v62, %v152_v61 }
 0x1a6   :  { %v215_v6 = vmax.f32 %v208_v2, 0.0 }
 0x1a8   :  { %v220_v9 = vpack.c.bf16 %v215_v6, %v214_v5 }
 0x1aa   :  { %235 = vmatpush.bf16.msra.mxu2 %v220_v9 }
 0x1ae   :  { %236 = vmatpush.bf16.msra.mxu2 %v219_v15 }
 0x1b2   :  { %237 = vmatpush.bf16.msra.mxu2 %v218_v17 }
 0x1b5   :  { %383 = vmatmul.msk.bf16.vlgmr.msra.gmra.mxu2 %vm226_vm4, %v396_v18 }
 0x238   :  { %v239_v21 = vpop.f32.mrf.mxu2 }
 0x240   :  { %v241_v22 = vpop.f32.mrf.mxu2 }
 0x241   :  { %v244_v23 = vpack.c.bf16 %v241_v22, %v239_v21 }
 0x243   :  { %392 = vmatmul.msk.bf16.vlgmr.msra.gmra.mxu3 %vm176_vm3, %v244_v23 }
 0x2c6   :  { %v273_v25 = vpop.f32.mrf.mxu3 }
 0x2c7   :  { %280 = vrot.lane.b32.xlu0 %v273_v25, %s457_s18 }
 0x2ce   :  { %v275_v27 = vpop.f32.mrf.mxu3 }
 0x2cf   :  { %282 = vrot.lane.b32.xlu1 %v275_v27, %s457_s18  ;;  %294 = vrot.lane.b32.xlu0 %v289_v26, %s457_s18 }
 0x2d7   :  { %305 = vrot.lane.b32.xlu1 %v426_v28, %s457_s18 }
 0x339   :  { %v281_v29 = vpop.permute.xlu0 %280 }
 0x33a   :  { %v286_v30 = vadd.f32 %v281_v29, %v521_v10 }
 0x33c   :  { %v298_v35 = vadd.f32 %v293_v31, %v286_v30 }
 0x33e   :  { %v300_v37 = vmax.f32 %v298_v35, 0.0 }
 0x341   :  { %v283_v32 = vpop.permute.xlu1 %282  ;;  %v295_v33 = vpop.permute.xlu0 %294 }
 0x342   :  { %v287_v34 = vadd.f32 %v283_v32, %v523_v11 }
 0x344   :  { %v299_v36 = vadd.f32 %v295_v33, %v287_v34 }
 0x346   :  { %v301_v38 = vmax.f32 %v299_v36, 0.0 }
 0x349   :  { %v306_v39 = vpop.permute.xlu1 %305 }
 0x34a   :  { %v308_v40 = vmul.f32 %v306_v39, %v300_v37  ;;  %v309_v41 = vmul.f32 %v306_v39, %v301_v38 }
 0x34c   :  { %314 = vrot.lane.b32.xlu0 %v309_v41, %s457_s18  ;;  %312 = vrot.lane.b32.xlu2 %v308_v40, %s457_s18 }
 0x354   :  { %341 = vperm.xlu0 %423, %v338_v42  }
 0x3a6   :  { %v313_v10 = vpop.permute.xlu2 %312 }
 0x3a7   :  { %v318_v43 = vsel %vm176_vm3, %v313_v10, 0.0 }
 0x3a8   :  { %319 = vadd.xlane.f32.xlu1 %v318_v43 }
 0x3be   :  { %v315_v44 = vpop.permute.xlu0 %314 }
 0x3bf   :  { %v321_v11 = vsel %vm176_vm3, %v315_v44, 0.0 }
 0x3c0   :  { %322 = vadd.xlane.f32.xlu2 %v321_v11 }
 0x3c6   :  { %v342_v59 = vpop.permute.xlu0 %341 }
 0x41b   :  { %v320_v46 = vpop.xlane.xlu1 %319 }
 0x41c   :  { %v326_v48 = vmul.f32 %v324_v45, %v320_v46 }
 0x41e   :  { %v329_v51 = vsel %vm328_vm5, %v326_v48, 0.0 }
 0x433   :  { %v323_v49 = vpop.xlane.xlu2 %322 }
 0x434   :  { %v327_v50 = vmul.f32 %v325_v47, %v323_v49 }
 0x436   :  { %v330_v52 = vsel %vm328_vm5, %v327_v50, 0.0 }
 0x437   :  { %v331_v53 = vadd.f32 %v330_v52, %v329_v51 }
 0x439   :  { %v332_v54 = vrot.slane %v331_v53, 4 }
 0x43b   :  { %v333_v55 = vadd.f32 %v332_v54, %v331_v53 }
 0x43d   :  { %v334_v56 = vrot.slane %v333_v55, 2 }
 0x43f   :  { %v335_v57 = vadd.f32 %v334_v56, %v333_v55 }
 0x441   :  { %v336_v58 = vrot.slane %v335_v57, 1 }
 0x443   :  { %v337_v60 = vadd.f32 %v336_v58, %v335_v57 }
 0x445   :  { %v344_v61 = vadd.f32 %v342_v59, %v337_v60 }
 0x447   :  { %346 = vst.msk [vmem:[#allocation2] sm:$0x1] %vm345_vm6, %v344_v61 }
 0x448   :  { %357 = dma.vmem_to_hbm [thread:$0]  %s353_s27, 16, %s355_s30, [#allocation3]  }
 0x449   :  { %451 = dma.done.wait [#allocation3], 16  }
 0x44a   :  { %452 = vsyncadd [#allocation3], 4294967280 }
 0x44b   :  { %362 = vsyncpa [#allocation3], 1 }

</bundles_post_ra>
